<compile_context>
chip_gen: v5e
topology: v5e:2x2
jax: 0.10.0
libtpu: 0.0.40
codegen_flags: <defaults>
</compile_context>

<pallas_src>
import math

import numpy as np
import jax
import jax.numpy as jnp
from jax.experimental import pallas as pl
from jax.experimental.pallas import tpu as pltpu

_MiB = 1024 * 1024


def _round_up(x, m):
    return ((x + m - 1) // m) * m


def _pad2d(a, rows, cols, dtype):
    out = jnp.zeros((rows, cols), dtype)
    return out.at[: a.shape[0], : a.shape[1]].set(a.astype(dtype))


def _vmem_capacity_bytes():
    try:
        return int(pltpu.get_tpu_info().vmem_capacity_bytes)
    except Exception:
        return 64 * _MiB  # conservative (v7x per-core) fallback


def _concrete_is_binary(adj):
    """True iff adj is a concrete array containing only 0/1 (exact in int8)."""
    try:
        a = np.asarray(adj)
    except Exception:  # traced value -> can't check, stay conservative
        return False
    return bool(np.all((a == 0) | (a == 1)))


def _choose_tiles(n, stream_f_p, out_f_p, acc_f_p, w_res_bytes, adj_elem_bytes,
                  budget, force_tm=None, force_tk=None, force_x_resident=None):
    """Pick (tm, tk, x_resident) under a VMEM byte budget.

    Budget counts: double-buffered adj tile, feature stream (resident slab or
    per-k double-buffered tile), double-buffered f32 output tile, f32
    accumulator scratch and the resident bf16 weight.
    """
    tm_cap = min(1024, max(16, _round_up(n, 16)))
    tk_cap = min(2048, max(128, _round_up(n, 128)))
    if force_tm is not None:
        assert force_tm % 16 == 0, "block_m must be a multiple of 16"
        tm_cands = [int(force_tm)]
    else:
        tm_cands = sorted({t for t in (1024, 512, 256, 128, 64, 32, 16)
                           if t <= tm_cap} | {tm_cap}, reverse=True)
    if force_tk is not None:
        assert force_tk % 128 == 0, "block_k must be a multiple of 128"
        tk_cands = [int(force_tk)]
    else:
        tk_cands = sorted({t for t in (2048, 1024, 512, 256, 128)
                           if t <= tk_cap} | {tk_cap}, reverse=True)
    x_res_opts = (True, False) if force_x_resident is None else (bool(force_x_resident),)

    def footprint(tm, tk, x_res):
        n_cols_p = _round_up(n, tk)
        adj_b = 2 * tm * tk * adj_elem_bytes                               # 2x buffered adj tile
        x_b = (2 * n_cols_p * stream_f_p * 2) if x_res else (2 * tk * stream_f_p * 2)
        out_b = 2 * tm * out_f_p * 4                                       # 2x buffered f32 out
        acc_b = tm * acc_f_p * 4                                           # f32 accumulator
        return adj_b + x_b + out_b + acc_b + w_res_bytes + 2 * out_f_p * 4

    best, best_score = None, None
    for tm in tm_cands:
        for tk in tk_cands:
            for x_res in x_res_opts:
                if footprint(tm, tk, x_res) > budget:
                    continue
                score = (1 if x_res else 0, tm * tk, tm)
                if best_score is None or score > best_score:
                    best, best_score = (tm, tk, x_res), score
    if best is None:
        # TODO(synk): for very wide features add an out_f grid axis instead of
        # shrinking tiles; for now fall back to smallest tiles, streamed x.
        best = (tm_cands[-1], tk_cands[-1], False)
    return best


def _make_pre_w_kernel(tk, x_resident):
    """acc += (adj+I)[i,k] @ x[k];  finalize: out = (acc.bf16 @ W.bf16) + b."""
    def kernel(adj_ref, x_ref, w_ref, b_ref, o_ref, acc_ref):
        k = pl.program_id(1)

        @pl.when(k == 0)
        def _init():
            acc_ref[...] = jnp.zeros_like(acc_ref)

        a = adj_ref[...].astype(jnp.bfloat16)   # int8/bf16 -> bf16 (VPU, hidden under DMA)
        if x_resident:
            xk = x_ref[pl.ds(pl.multiple_of(k * tk, tk), tk), :]
        else:
            xk = x_ref[...]
        acc_ref[...] += jnp.dot(a, xk, preferred_element_type=jnp.float32)

        @pl.when(k == pl.num_programs(1) - 1)
        def _finalize():
            h = acc_ref[...].astype(jnp.bfloat16)       # bf16 x bf16 MXU path
            out = jnp.dot(h, w_ref[...], preferred_element_type=jnp.float32)
            o_ref[...] = (out + b_ref[...]).astype(o_ref.dtype)

    return kernel


def _make_post_w_kernel(tk, x_resident):
    """o (resident) += (adj+I)[i,k] @ h[k];  finalize: o += b.  (h = x @ W)"""
    def kernel(adj_ref, h_ref, b_ref, o_ref):
        k = pl.program_id(1)

        @pl.when(k == 0)
        def _init():
            o_ref[...] = jnp.zeros_like(o_ref)

        a = adj_ref[...].astype(jnp.bfloat16)
        if x_resident:
            hk = h_ref[pl.ds(pl.multiple_of(k * tk, tk), tk), :]
        else:
            hk = h_ref[...]
        o_ref[...] += jnp.dot(a, hk, preferred_element_type=jnp.float32)

        @pl.when(k == pl.num_programs(1) - 1)
        def _finalize():
            o_ref[...] += b_ref[...]

    return kernel


def my_graph_convolution(x, adj, weight, bias=None, *, block_m=None, block_k=None,
                         adj_is_binary=None, x_resident=None):
    """Pallas port of my_GraphConvolution.forward(input=x, adj).

    adj    : (N, N) dense adjacency (== adj.to_dense() in the torch module)
    x      : (N, in_features)
    weight : (in_features, out_features)
    bias   : (out_features,) or None
    """
    n, in_f = x.shape
    in_f_w, out_f = weight.shape
    assert in_f_w == in_f and adj.shape == (n, n)

    in_f_p = _round_up(in_f, 128)
    out_f_p = _round_up(out_f, 128)               # lane-dense output stores
    post_w = out_f_p < in_f_p                     # contract adj against the narrower width
    stream_f_p = out_f_p if post_w else in_f_p
    acc_f_p = 0 if post_w else in_f_p             # post_w accumulates in o_ref, no scratch

    if adj_is_binary is None:
        adj_is_binary = _concrete_is_binary(adj)
    # Binary (0/1) adjacency -> int8 HBM storage (exact, even after +I).
    # Non-binary (e.g. degree-normalized) -> bf16 storage: deliberate ~0.2%/elem
    # loosening vs. the f32 torch reference, covered by the test tolerance.
    adj_store_dtype = jnp.int8 if adj_is_binary else jnp.bfloat16
    adj_elem_bytes = 1 if adj_is_binary else 2

    vmem_cap = _vmem_capacity_bytes()
    budget = int(0.70 * vmem_cap)
    vmem_limit = int(0.85 * vmem_cap)

    w_res_bytes = 0 if post_w else 2 * in_f_p * out_f_p * 2   # resident bf16 weight (x2 bufs)

    tm, tk, x_res = _choose_tiles(n, stream_f_p, out_f_p, acc_f_p, w_res_bytes,
                                  adj_elem_bytes, budget,
                                  force_tm=block_m, force_tk=block_k,
                                  force_x_resident=x_resident)

    n_rows_p = _round_up(n, tm)                   # independent per-axis padding (no lcm)
    n_cols_p = _round_up(n, tk)
    grid = (n_rows_p // tm, n_cols_p // tk)       # (rows: parallel, K: reduction, last)

    # Fold the residual into the adjacency: (adj + I) @ x == adj @ x + x.
    diag = jnp.arange(n)
    adj_pi = adj.astype(jnp.float32).at[diag, diag].add(1.0)
    adj_p = _pad2d(adj_pi, n_rows_p, n_cols_p, adj_store_dtype)

    if bias is None:
        b_p = jnp.zeros((1, out_f_p), jnp.float32)
    else:
        b_p = _pad2d(bias.reshape(1, out_f), 1, out_f_p, jnp.float32)

    cparams = pltpu.CompilerParams(
        dimension_semantics=("parallel", "arbitrary"),
        vmem_limit_bytes=vmem_limit,
    )

    x_passes = 1 if x_res else grid[0]            # restream factor for the cost model

    if not post_w:
        # out = (adj + I) @ x @ W + b
        x_p = _pad2d(x, n_cols_p, in_f_p, jnp.bfloat16)
        w_p = _pad2d(weight, in_f_p, out_f_p, jnp.bfloat16)
        x_spec = (pl.BlockSpec((n_cols_p, in_f_p), lambda i, k: (0, 0)) if x_res
                  else pl.BlockSpec((tk, in_f_p), lambda i, k: (k, 0)))
        cost = pl.CostEstimate(
            flops=2 * n_rows_p * n_cols_p * in_f_p + 2 * n_rows_p * in_f_p * out_f_p,
            transcendentals=0,
            bytes_accessed=(adj_elem_bytes * n_rows_p * n_cols_p     # adj (int8/bf16)
                            + 2 * n_cols_p * in_f_p * x_passes       # x (bf16, restream factor)
                            + 2 * in_f_p * out_f_p                   # weight (bf16, resident)
                            + 4 * n_rows_p * out_f_p + 4 * out_f_p), # output + bias (f32)
        )
        out_p = pl.pallas_call(
            _make_pre_w_kernel(tk, x_res),
            out_shape=jax.ShapeDtypeStruct((n_rows_p, out_f_p), jnp.float32),
            grid_spec=pltpu.PrefetchScalarGridSpec(
                num_scalar_prefetch=0,
                grid=grid,
                in_specs=[
                    pl.BlockSpec((tm, tk), lambda i, k: (i, k)),            # (adj+I) tile
                    x_spec,                                                 # features
                    pl.BlockSpec((in_f_p, out_f_p), lambda i, k: (0, 0)),   # weight (resident)
                    pl.BlockSpec((1, out_f_p), lambda i, k: (0, 0)),        # bias   (resident)
                ],
                out_specs=pl.BlockSpec((tm, out_f_p), lambda i, k: (i, 0)),
                scratch_shapes=[pltpu.VMEM((tm, in_f_p), jnp.float32)],     # (adj+I)@x acc
            ),
            compiler_params=cparams,
            cost_estimate=cost,
        )(adj_p, x_p, w_p, b_p)
    else:
        # out = (adj + I) @ (x @ W) + b — identical algebra, narrower contraction.
        # Small O(N*in_f*out_f) pre-matmul left to XLA; h produced directly as bf16.
        h = jnp.dot(x.astype(jnp.float32), weight.astype(jnp.float32),
                    preferred_element_type=jnp.float32).astype(jnp.bfloat16)
        h_p = _pad2d(h, n_cols_p, out_f_p, jnp.bfloat16)
        h_spec = (pl.BlockSpec((n_cols_p, out_f_p), lambda i, k: (0, 0)) if x_res
                  else pl.BlockSpec((tk, out_f_p), lambda i, k: (k, 0)))
        cost = pl.CostEstimate(
            flops=2 * n_rows_p * n_cols_p * out_f_p,
            transcendentals=0,
            bytes_accessed=(adj_elem_bytes * n_rows_p * n_cols_p
                            + 2 * n_cols_p * out_f_p * x_passes
                            + 4 * n_rows_p * out_f_p + 4 * out_f_p),
        )
        out_p = pl.pallas_call(
            _make_post_w_kernel(tk, x_res),
            out_shape=jax.ShapeDtypeStruct((n_rows_p, out_f_p), jnp.float32),
            grid_spec=pltpu.PrefetchScalarGridSpec(
                num_scalar_prefetch=0,
                grid=grid,
                in_specs=[
                    pl.BlockSpec((tm, tk), lambda i, k: (i, k)),        # (adj+I) tile
                    h_spec,                                             # h = x @ W
                    pl.BlockSpec((1, out_f_p), lambda i, k: (0, 0)),    # bias (resident)
                ],
                out_specs=pl.BlockSpec((tm, out_f_p), lambda i, k: (i, 0)),
                scratch_shapes=[],                                      # accumulate in o_ref
            ),
            compiler_params=cparams,
            cost_estimate=cost,
        )(adj_p, h_p, b_p)

    return out_p[:n, :out_f]


if __name__ == "__main__":
    key = jax.random.PRNGKey(0)
    keys = jax.random.split(key, 8)

    def rel_err(out, ref):
        return float(jnp.max(jnp.abs(out - ref)) / (jnp.max(jnp.abs(ref)) + 1e-6))

    # case 1: non-power-of-two N (old lcm padding would have exploded), pre-W
    # path, binary adj -> int8 HBM storage, forced small tiles -> (4, 2) grid
    # exercising init/accumulate/finalize, auto-resident features sliced w/ pl.ds.
    N1, IN1, OUT1 = 200, 96, 80
    stdv1 = 1.0 / math.sqrt(OUT1)
    w1 = jax.random.uniform(keys[0], (IN1, OUT1), jnp.float32, -stdv1, stdv1)
    b1 = jax.random.uniform(keys[1], (OUT1,), jnp.float32, -stdv1, stdv1)
    adj1 = (jax.random.uniform(keys[2], (N1, N1), jnp.float32) > 0.7).astype(jnp.float32)
    x1 = jax.random.normal(keys[3], (N1, IN1), jnp.float32)
    out1 = jax.block_until_ready(
        my_graph_convolution(x1, adj1, w1, b1, block_m=64, block_k=128))
    ref1 = (adj1 @ x1 + x1) @ w1 + b1
    assert out1.shape == (N1, OUT1)
    assert rel_err(out1, ref1) < 2e-2, f"case1 rel err {rel_err(out1, ref1)}"

    # case 2: post-W path (out_f < in_f -> contract adj against x @ W), no bias,
    # forced streamed features (per-k BlockSpec) + accumulate-into-output.
    N2, IN2, OUT2 = 256, 256, 64
    w2 = jax.random.uniform(keys[4], (IN2, OUT2), jnp.float32, -0.125, 0.125)
    x2 = jax.random.normal(keys[5], (N2, IN2), jnp.float32)
    adj2 = (jax.random.uniform(keys[6], (N2, N2), jnp.float32) > 0.7).astype(jnp.float32)
    out2 = jax.block_until_ready(
        my_graph_convolution(x2, adj2, w2, None, block_m=128, block_k=128,
                             x_resident=False))
    ref2 = (adj2 @ x2 + x2) @ w2
    assert out2.shape == (N2, OUT2)
    assert rel_err(out2, ref2) < 2e-2, f"case2 rel err {rel_err(out2, ref2)}"

    # case 3: degree-normalized (non-binary) adjacency -> auto-detected, bf16
    # HBM storage; fully automatic tile / residency selection.
    N3, IN3, OUT3 = 192, 64, 96
    stdv3 = 1.0 / math.sqrt(OUT3)
    w3 = jax.random.uniform(keys[7], (IN3, OUT3), jnp.float32, -stdv3, stdv3)
    b3 = jax.random.uniform(keys[1], (OUT3,), jnp.float32, -stdv3, stdv3)
    x3 = jax.random.normal(keys[3], (N3, IN3), jnp.float32)
    a3 = (jax.random.uniform(keys[2], (N3, N3), jnp.float32) > 0.6).astype(jnp.float32)
    deg = jnp.clip(a3.sum(axis=1, keepdims=True), 1.0, None)
    adj3 = a3 / deg
    out3 = jax.block_until_ready(my_graph_convolution(x3, adj3, w3, b3))
    ref3 = (adj3 @ x3 + x3) @ w3 + b3
    assert out3.shape == (N3, OUT3)
    assert rel_err(out3, ref3) < 2.5e-2, f"case3 rel err {rel_err(out3, ref3)}"

    print("KERNEL_OK")
</pallas_src>

<mosaic_0001>
module attributes {stable_mosaic.version = 11 : i64} {
  func.func @kernel(%arg0: i32, %arg1: i32, %arg2: memref<64x128xi8, #tpu.memory_space<vmem>>, %arg3: memref<256x128xbf16, #tpu.memory_space<vmem>>, %arg4: memref<128x128xbf16, #tpu.memory_space<vmem>>, %arg5: memref<1x128xf32, #tpu.memory_space<vmem>>, %arg6: memref<64x128xf32, #tpu.memory_space<vmem>>, %arg7: memref<64x128xf32, #tpu.memory_space<vmem>>) attributes {dimension_semantics = [#tpu.dimension_semantics<parallel>, #tpu.dimension_semantics<arbitrary>], iteration_bounds = array<i64: 4, 2>, scalar_prefetch = 0 : i64, scratch_operands = 1 : i64, tpu.core_type = #tpu.core_type<tc>, window_params = [{transform_indices = @transform_0, window_bounds = array<i64: 64, 128>}, {pipeline_mode = #tpu.pipeline_mode<synchronous>, transform_indices = @transform_1, window_bounds = array<i64: 256, 128>}, {pipeline_mode = #tpu.pipeline_mode<synchronous>, transform_indices = @transform_2, window_bounds = array<i64: 128, 128>}, {pipeline_mode = #tpu.pipeline_mode<synchronous>, transform_indices = @transform_3, window_bounds = array<i64: 1, 128>}, {transform_indices = @transform_4, window_bounds = array<i64: 64, 128>}]} {
    %c0_i32 = arith.constant 0 : i32
    %0 = arith.cmpi eq, %arg1, %c0_i32 : i32
    %1 = arith.extui %0 : i1 to i32
    %c0_i32_0 = arith.constant 0 : i32
    %2 = arith.cmpi ne, %1, %c0_i32_0 : i32
    scf.if %2 {
      %cst_8 = arith.constant 0.000000e+00 : f32
      %16 = vector.broadcast %cst_8 : f32 to vector<64x128xf32>
      %c0_9 = arith.constant 0 : index
      %c0_10 = arith.constant 0 : index
      %17 = vector.load %arg7[%c0_9, %c0_10] : memref<64x128xf32, #tpu.memory_space<vmem>>, vector<64x128xf32>
      tpu.vector_store %arg7[%c0_9, %c0_10], %16 {strides = array<i32>} : memref<64x128xf32, #tpu.memory_space<vmem>>, vector<64x128xf32>,
    } else {
    }
    %c0 = arith.constant 0 : index
    %c0_1 = arith.constant 0 : index
    %3 = vector.load %arg2[%c0, %c0_1] : memref<64x128xi8, #tpu.memory_space<vmem>>, vector<64x128xi8>
    %4 = arith.sitofp %3 : vector<64x128xi8> to vector<64x128xbf16>
    %c128_i32 = arith.constant 128 : i32
    %5 = arith.muli %arg1, %c128_i32 : i32
    %6 = tpu.assume_multiple %5, 128 : i32
    %7 = arith.index_cast %6 : i32 to index
    %c0_2 = arith.constant 0 : index
    %8 = vector.load %arg3[%7, %c0_2] : memref<256x128xbf16, #tpu.memory_space<vmem>>, vector<128x128xbf16>
    %c0_3 = arith.constant 0 : index
    %c0_4 = arith.constant 0 : index
    %9 = vector.load %arg7[%c0_3, %c0_4] : memref<64x128xf32, #tpu.memory_space<vmem>>, vector<64x128xf32>
    %cst = arith.constant dense<0.000000e+00> : vector<64x128xf32>
    %10 = tpu.matmul %4, %8, %cst {dimension_numbers = #tpu.dot_dimension_numbers<[1], [0], [0], [1], [0, 0, 1, 1], [], []>} : vector<64x128xbf16>, vector<128x128xbf16>, vector<64x128xf32> -> vector<64x128xf32>
    %11 = arith.addf %9, %10 : vector<64x128xf32>
    %c0_5 = arith.constant 0 : index
    %c0_6 = arith.constant 0 : index
    %12 = vector.load %arg7[%c0_5, %c0_6] : memref<64x128xf32, #tpu.memory_space<vmem>>, vector<64x128xf32>
    tpu.vector_store %arg7[%c0_5, %c0_6], %11 {strides = array<i32>} : memref<64x128xf32, #tpu.memory_space<vmem>>, vector<64x128xf32>,
    %c1_i32 = arith.constant 1 : i32
    %13 = arith.cmpi eq, %arg1, %c1_i32 : i32
    %14 = arith.extui %13 : i1 to i32
    %c0_i32_7 = arith.constant 0 : i32
    %15 = arith.cmpi ne, %14, %c0_i32_7 : i32
    scf.if %15 {
      %c0_8 = arith.constant 0 : index
      %c0_9 = arith.constant 0 : index
      %16 = vector.load %arg7[%c0_8, %c0_9] : memref<64x128xf32, #tpu.memory_space<vmem>>, vector<64x128xf32>
      %17 = arith.truncf %16 : vector<64x128xf32> to vector<64x128xbf16>
      %c0_10 = arith.constant 0 : index
      %c0_11 = arith.constant 0 : index
      %18 = vector.load %arg4[%c0_10, %c0_11] : memref<128x128xbf16, #tpu.memory_space<vmem>>, vector<128x128xbf16>
      %cst_12 = arith.constant dense<0.000000e+00> : vector<64x128xf32>
      %19 = tpu.matmul %17, %18, %cst_12 {dimension_numbers = #tpu.dot_dimension_numbers<[1], [0], [0], [1], [0, 0, 1, 1], [], []>} : vector<64x128xbf16>, vector<128x128xbf16>, vector<64x128xf32> -> vector<64x128xf32>
      %c0_13 = arith.constant 0 : index
      %c0_14 = arith.constant 0 : index
      %20 = vector.load %arg5[%c0_13, %c0_14] : memref<1x128xf32, #tpu.memory_space<vmem>>, vector<1x128xf32>
      %21 = vector.broadcast %20 : vector<1x128xf32> to vector<64x128xf32>
      %22 = arith.addf %19, %21 : vector<64x128xf32>
      %c0_15 = arith.constant 0 : index
      %c0_16 = arith.constant 0 : index
      %23 = vector.load %arg6[%c0_15, %c0_16] : memref<64x128xf32, #tpu.memory_space<vmem>>, vector<64x128xf32>
      tpu.vector_store %arg6[%c0_15, %c0_16], %22 {strides = array<i32>} : memref<64x128xf32, #tpu.memory_space<vmem>>, vector<64x128xf32>,
    } else {
    }
    return
  }
  func.func @transform_0(%arg0: i32, %arg1: i32) -> (i32, i32) {
    %c0_i32 = arith.constant 0 : i32
    return %arg0, %arg1 : i32, i32
  }
  func.func @transform_1(%arg0: i32, %arg1: i32) -> (i32, i32) {
    %c0_i32 = arith.constant 0 : i32
    %c0_i32_0 = arith.constant 0 : i32
    %c0_i32_1 = arith.constant 0 : i32
    return %c0_i32, %c0_i32_0 : i32, i32
  }
  func.func @transform_2(%arg0: i32, %arg1: i32) -> (i32, i32) {
    %c0_i32 = arith.constant 0 : i32
    %c0_i32_0 = arith.constant 0 : i32
    %c0_i32_1 = arith.constant 0 : i32
    return %c0_i32, %c0_i32_0 : i32, i32
  }
  func.func @transform_3(%arg0: i32, %arg1: i32) -> (i32, i32) {
    %c0_i32 = arith.constant 0 : i32
    %c0_i32_0 = arith.constant 0 : i32
    %c0_i32_1 = arith.constant 0 : i32
    return %c0_i32, %c0_i32_0 : i32, i32
  }
  func.func @transform_4(%arg0: i32, %arg1: i32) -> (i32, i32) {
    %c0_i32 = arith.constant 0 : i32
    %c0_i32_0 = arith.constant 0 : i32
    return %arg0, %c0_i32 : i32, i32
  }
}

</mosaic_0001>

<bundles_post_ra>
// kernel: tpu_custom_call.1
= control target key start
LH: loop header
LB: loop body
LE: loop exit
PB: predicated region body
PF: predicated region fallthrough
CT: control target
= control target key end

     0   :  { %s1440_s0 = inlined_call_operand.hbm [shape: s8[256,256], index: 0, kind: input, shape index: {}]   ;;  %s1441_s1 = inlined_call_operand.hbm [shape: bf16[256,128], index: 1, kind: input, shape index: {}]   ;;  %s1442_s2 = inlined_call_operand.hbm [shape: bf16[128,128], index: 2, kind: input, shape index: {}]   ;;  %s1443_s3 = inlined_call_operand.vmem [shape: f32[1,128], index: 3, kind: input, shape index: {}]   ;;  %s1444_s4 = inlined_call_operand.hbm [shape: f32[256,128], index: 4, kind: output, shape index: {}]  }
   0x1   :  { %1452 = sst [smem:[#allocation19_spill]] %s1441_s1 }
   0x2   :  { %1453 = sst [smem:[#allocation20_spill]] %s1442_s2 }
   0x3   :  { %1454 = sst [smem:[#allocation21_spill]] %s1443_s3 }
   0x4   :  { %1455 = sst [smem:[#allocation22_spill]] %s1444_s4 }
   0x5   :  { %9 = vsyncpa [#allocation4], 0 }
   0x6   :  { %11 = vsyncpa [#allocation4 + $0x1], 0 }
   0x7   :  { %12 = vsyncpa [#allocation7], 0 }
   0x8   :  { %13 = vsyncpa [#allocation5], 0 }
   0x9   :  { %15 = vsyncpa [#allocation5 + $0x1], 0  ;;  %s1208_s15 = smov 0   ;;  %s1210_s16 = smov 0  }
   0xa   :  { %s1212_s17 = smov 0   ;;  %s1214_s18 = smov 0  }
   0xb   :  { %s1216_s19 = smov 0   ;;  %s1218_s20 = smov 0  }
   0xc   :  { %s1220_s21 = smov 0   ;;  %s1222_s22 = smov 0  }
   0xd   :  { %s1224_s23 = smov 0   ;;  %s1226_s24 = smov 0  }
   0xe   :  { %s1228_s25 = smov 0  }
   0xf LB: > { %1456 = sst [smem:[#allocation13_spill]] %s1131_s15  ;;  %s669_s26 = sadd.s32 4294967295, %s1171_s25   ;;  %s1171_s25 = sphi %s1228_s25, %s21_s25   ;;  %s1167_s24 = sphi %s1226_s24, %s1488_s24   ;;  %s1163_s23 = sphi %s1224_s23, %s1487_s23   ;;  %s1159_s22 = sphi %s1222_s22, %s1486_s22   ;;  %s1155_s21 = sphi %s1220_s21, %s1485_s21   ;;  %s1151_s20 = sphi %s1218_s20, %s1484_s20   ;;  %s1147_s19 = sphi %s1216_s19, %s1483_s19   ;;  %s1143_s18 = sphi %s1214_s18, %s1482_s18   ;;  %s1139_s17 = sphi %s1212_s17, %s1481_s17   ;;  %s1135_s16 = sphi %s1210_s16, %s1480_s16   ;;  %s1131_s15 = sphi %s1208_s15, %s1479_s15  }
  0x10   : > { %1457 = sst [smem:[#allocation14_spill]] %s1155_s21  ;;  %s670_s27 = sadd.s32 4294967294, %s1171_s25  }
  0x11   : > { %1458 = sst [smem:[#allocation15_spill]] %s1159_s22  ;;  %p55_p0 = scmp.ne.s32.totalorder %s1147_s19, %s1143_s18 }
  0x12   : > { %p1264_p1 = scmp.eq.s32.totalorder %s669_s26, 0  ;;  %p141_p2 = scmp.ne.s32.totalorder %s1139_s17, %s1135_s16 }
  0x13   : > { %p142_p3 = scmp.eq.s32.totalorder %s669_s26, 7  ;;  %p147_p5 = scmp.ne.s32.totalorder %s1135_s16, %s1131_s15 }
  0x14   : > { %p1272_p4 = por %p1264_p1, %p55_p0  ;;  %p148_p7 = scmp.eq.s32.totalorder %s670_s27, 7 }
  0x15   : > { %p1278_p6 = por %p142_p3, %p141_p2  ;;  %p671_p8 = scmp.ge.s32.totalorder %s1171_s25, 1 }
  0x16   : > { %p155_p9 = scmp.lt.s32.totalorder %s1171_s25, 9  ;;  %p1284_p10 = por %p148_p7, %p147_p5 }
  0x17   : > { %s1461_s30 = scalar_select %p1278_p6, 1, 0 }
  0x18   : > { %s1463_s5 = scalar_select %p1284_p10, 1, 0 }
  0x19   : > { %1462 = sst [smem:[#allocation16_spill]] %s1461_s30  ;;  %p1288_p11 = pnand %p671_p8, %p155_p9 }
  0x1a   : > { %1464 = sst [smem:[#allocation17_spill]] %s1463_s5  ;;  %s1173_s10 = smov [#allocation6]  }
  0x1b   : > { %s1466_s1 = sld [smem:[#allocation19_spill]]  ;;  %p835_p12 = pneg %p1288_p11 }
  0x1c   : > { %s168_s11 = sshll.u32 %s1173_s10, 4  ;;  %s1467_s2 = sld [smem:[#allocation20_spill]]  ;;  %s169_s11 = int_to_ptr.vmem [resolvable:$true] %s168_s11 }
  0x1d   : > { %p836_p13 = pnand %p835_p12, %p1264_p1  ;;  %s1174_s18 = smov 64  }
  0x1e   : > { %s1175_s26 = smov 4   ;;  %s1176_s27 = smov [#allocation8]  }
  0x1f   : > { %s182_s7 = sshll.u32 %s1176_s27, 4  ;;  %s30_s8 = sadd.s32 1, %s1163_s23  ;;  %s183_s7 = int_to_ptr.vmem [resolvable:$true] %s182_s7 }
  0x20   : > { %p31_p0 = scmp.ge.s32.totalorder %s30_s8, 2  ;;  %s33_s10 = sadd.s32 1, %s1167_s24 }
  0x21   : > { %s166_s9 = sshll.u32 %s1466_s1, 4  ;;  %s42_s12 = sadd.s32 1, %s1151_s20  ;;  %s167_s9 = int_to_ptr.hbm [resolvable:$true] %s166_s9 }
  0x22   : > { %s180_s14 = sshll.u32 %s1467_s2, 4  ;;  %p49_p2 = scmp.ne.s32.totalorder %s1151_s20, %s1147_s19  ;;  %s181_s14 = int_to_ptr.hbm [resolvable:$true] %s180_s14 }
  0x23   : > { %838 = dma.hbm_to_vmem [thread:$0]  (!%p836_p13), %s167_s9, 2048, %s169_s11, [#allocation7], %s1174_s18, %s1174_s18, %s1175_s26  }
  0x24   : > { %841 = dma.hbm_to_vmem [thread:$0]  (!%p836_p13), %s181_s14, 1024, %s183_s7, [#allocation7], %s1174_s18, %s1174_s18, %s1175_s26  }
  0x25   : > { %s1490_s8 = smov (%p31_p0, %s30_s8), 0  ;;  %s1492_s10 = smov (!%p31_p0, %s33_s10), %s1167_s24 }
  0x26   : > { %1468 = sst [smem:[#allocation18_spill]] %s1490_s8  ;;  %s38_s9 = ssub.s32 %s1163_s23, %s1490_s8 }
  0x27   : > { %p50_p3 = scmp.eq.s32.totalorder %s1171_s25, 0  ;;  %p35_p5 = scmp.ge.s32.totalorder %s1492_s10, 4 }
  0x28   : > { %s131_s11 = sadd.s32 1, %s1139_s17  ;;  %p852_p8 = scmp.lt.s32.totalorder %s1171_s25, 8 }
  0x29   : > { %p1314_p7 = por %p50_p3, %p49_p2  ;;  %s1494_s10 = smov (%p35_p5, %s1492_s10), 0 }
  0x2a   : > { %s199_s14 = sand.u32 1, %s1151_s20   ;;  %s757_s18 = sshll.u32 %s1167_s24, 2 }
  0x2b   : > { %s37_s26 = ssub.s32 %s1167_s24, %s1494_s10  ;;  %s675_s7 = sshll.u32 %s199_s14, 4 }
  0x2c   : > { %s39_s27 = sor.u32 %s38_s9, %s37_s26  ;;  %p129_p9 = scmp.eq.s32.totalorder %s37_s26, 0 }
  0x2d   : > { %p40_p12 = scmp.eq.s32.totalorder %s39_s27, 0  ;;  %s208_s8 = sadd.s32 %s1163_s23, %s757_s18 }
  0x2e   : > { %s1326_s1 = scalar_select %p129_p9, %s1139_s17, %s131_s11  }
  0x2f   : > { %s1329_s2 = scalar_select %p40_p12, %s1151_s20, %s42_s12  }
  0x30   : > { %s678_s5 = sshll.u32 %s208_s8, 3  ;;  %s203_s15 = scalar_lea.vmem [#allocation3], %s675_s7 }
  0x31   : > { %s213_s4 = sshll.u32 %s203_s15, 4  ;;  %s210_s3 = scalar_lea.hbm %s1440_s0, %s678_s5  ;;  %s214_s4 = int_to_ptr.vmem [resolvable:$true] %s213_s4 }
  0x32   : > { %s211_s21 = sshll.u32 %s210_s3, 4  ;;  %p843_p13 = pnand %p852_p8, %p1314_p7  ;;  %s212_s21 = int_to_ptr.hbm [resolvable:$true] %s211_s21 }
  0x33   : > { %s200_s9 = scalar_lea.sflag [#allocation4], %s199_s14  ;;  %s1177_s26 = smov 256  }
  0x34   : > { %s1178_s11 = smov 128   ;;  %s1179_s27 = smov 8  }
  0x35   : > { %845 = dma.hbm_to_vmem [thread:$0]  (!%p843_p13), %s212_s21, 256, %s214_s4, %s200_s9, %s1177_s26, %s1178_s11, %s1179_s27  }
  0x36   : > { %225 = sbr.rel (%p1288_p11) target bundleno = 470 (0x1d6), region = 36  ;;  %s227_s15 = sand.u32 (!%p1288_p11), 1, %s1147_s19  }
  0x37   : > { %s1342_s8 = sshll.u32 (!%p1288_p11), %s227_s15, 4  ;;  %s228_s22 = scalar_lea.sflag (!%p1288_p11), [#allocation4], %s227_s15 }
  0x38   : > { %s231_s3 = scalar_lea.vmem (!%p1288_p11), [#allocation3], %s1342_s8 }
  0x3b   : > { %1118 = dma.done.wait (%p1272_p4), %s228_s22, 256  }
  0x3c   : > { %1120 = vsyncadd (%p1272_p4), %s228_s22, 4294967040 }
  0x3d   : > { %1122 = dma.done.wait (%p1264_p1), [#allocation7], 3072  }
  0x3e   : > { %1124 = vsyncadd (%p1264_p1), [#allocation7], 4294964224  ;;  %s264_s4 = sand.u32 1, %s1135_s16   ;;  %s1470_s5 = sld [smem:[#allocation14_spill]] }
  0x3f   : > { %s683_s21 = sshll.u32 %s264_s4, 6 }
  0x40   : > { %s1356_s30 = scalar_lea.vmem [#allocation9], %s683_s21 }
  0x44   : > { %p684_p11 = scmp.ne.s32.totalorder %s1470_s5, 0 }
  0x46   : > { %272 = sbr.rel (%p684_p11) target bundleno = 84 (0x54), region = 52 }
  0x4b   : > { %v1180_v0 = vmov 0.0  }
  0x4c   : > { %273 = vst [vmem:[#allocation2 + $0x30] sm:$0xff] %v1180_v0 }
  0x4d   : > { %274 = vst [vmem:[#allocation2] sm:$0xff] %v1180_v0 }
  0x4e   : > { %275 = vst [vmem:[#allocation2 + $0x18] sm:$0xff] %v1180_v0 }
  0x4f   : > { %276 = vst [vmem:[#allocation2 + $0x10] sm:$0xff] %v1180_v0 }
  0x50   : > { %277 = vst [vmem:[#allocation2 + $0x8] sm:$0xff] %v1180_v0 }
  0x51   : > { %278 = vst [vmem:[#allocation2 + $0x20] sm:$0xff] %v1180_v0 }
  0x52   : > { %279 = vst [vmem:[#allocation2 + $0x28] sm:$0xff] %v1180_v0 }
  0x53   : > { %280 = vst [vmem:[#allocation2 + $0x38] sm:$0xff] %v1180_v0 }
  0x54 PF: > { %s1471_s28 = sld [smem:[#allocation14_spill]]  ;;  %v281_v7 = vld [vmem:[%s231_s3] sm:$0xff]  ;;  %v282_v8 = vld [vmem:[%s231_s3 + $0x8] sm:$0xff] }
  0x55   : > { %v283_v9 = vunpack.c.0.s8 %v281_v7  ;;  %v284_v10 = vunpack.c.1.s8 %v281_v7  ;;  %v285_v11 = vunpack.c.2.s8 %v281_v7  ;;  %v286_v12 = vunpack.c.3.s8 %v281_v7  ;;  %v324_v31 = vld [vmem:[#allocation2 + $0x30] sm:$0xff]  ;;  %v326_v32 = vld [vmem:[#allocation2 + $0x18] sm:$0xff]  ;;  %v325_v39 = vld [vmem:[#allocation2] sm:$0xff] }
  0x56   : > { %v287_v14 = vunpack.c.0.s8 %v282_v8  ;;  %v288_v15 = vunpack.c.1.s8 %v282_v8  ;;  %v289_v16 = vunpack.c.2.s8 %v282_v8  ;;  %v290_v17 = vunpack.c.3.s8 %v282_v8  ;;  %v327_v40 = vld [vmem:[#allocation2 + $0x10] sm:$0xff] }
  0x57   : > { %v291_v18 = vcvt.s32.f32 %v283_v9  ;;  %v292_v19 = vcvt.s32.f32 %v284_v10  ;;  %v293_v20 = vcvt.s32.f32 %v285_v11  ;;  %v294_v21 = vcvt.s32.f32 %v286_v12  ;;  %v328_v37 = vld [vmem:[#allocation2 + $0x8] sm:$0xff] }
  0x58   : > { %v295_v23 = vcvt.s32.f32 %v287_v14  ;;  %v296_v24 = vcvt.s32.f32 %v288_v15  ;;  %v297_v25 = vcvt.s32.f32 %v289_v16  ;;  %v298_v26 = vcvt.s32.f32 %v290_v17  ;;  %v329_v49 = vld [vmem:[#allocation2 + $0x20] sm:$0xff] }
  0x59   : > { %v299_v27 = vpack.c.bf16 %v292_v19, %v291_v18  ;;  %v300_v28 = vpack.c.bf16 %v294_v21, %v293_v20  ;;  %v330_v38 = vld [vmem:[#allocation2 + $0x28] sm:$0xff] }
  0x5a   : > { %s685_s29 = sshll.u32 %s1471_s28, 7  ;;  %v301_v29 = vpack.c.bf16 %v296_v24, %v295_v23  ;;  %v302_v30 = vpack.c.bf16 %v298_v26, %v297_v25  ;;  %v331_v50 = vld [vmem:[#allocation2 + $0x38] sm:$0xff]  ;;  %p719_p1 = scmp.ne.s32.totalorder %s1471_s28, 1 }
  0x5b   : > { %s304_s6 = sshra.s32 %s685_s29, 3  ;;  %s1472_s7 = sld [smem:[#allocation21_spill]] (!%p719_p1) }
  0x5c   : > { %s686_s12 = sshll.u32 %s304_s6, 2 }
  0x5d   : > { %s1360_s13 = scalar_lea.vmem [#allocation6], %s686_s12 }
  0x5e   : > { %v765_v1 = vld [vmem:[%s1360_s13 + $0x38] sm:$0xff]  ;;  %v764_v2 = vld [vmem:[%s1360_s13 + $0x30] sm:$0xff]  ;;  %v763_v3 = vld [vmem:[%s1360_s13 + $0x28] sm:$0xff] }
  0x5f   : > { %380 = vmatpush.bf16.msra.mxu0 %v765_v1  ;;  %775 = vmatpush.bf16.msra.mxu1 %v765_v1  ;;  %v762_v4 = vld [vmem:[%s1360_s13 + $0x20] sm:$0xff]  ;;  %v761_v5 = vld [vmem:[%s1360_s13 + $0x18] sm:$0xff]  ;;  %v760_v6 = vld [vmem:[%s1360_s13 + $0x10] sm:$0xff] }
  0x60   : > { %776 = vmatpush.bf16.msra.mxu2 %v765_v1  ;;  %777 = vmatpush.bf16.msra.mxu3 %v765_v1  ;;  %v759_v13 = vld [vmem:[%s1360_s13 + $0x8] sm:$0xff]  ;;  %v758_v22 = vld [vmem:[%s1360_s13] sm:$0xff] }
  0x63   : > { %381 = vmatpush.bf16.msra.mxu0 %v764_v2  ;;  %778 = vmatpush.bf16.msra.mxu1 %v764_v2 }
  0x64   : > { %779 = vmatpush.bf16.msra.mxu2 %v764_v2  ;;  %780 = vmatpush.bf16.msra.mxu3 %v764_v2 }
  0x67   : > { %382 = vmatpush.bf16.msra.mxu0 %v763_v3  ;;  %781 = vmatpush.bf16.msra.mxu1 %v763_v3 }
  0x68   : > { %782 = vmatpush.bf16.msra.mxu2 %v763_v3  ;;  %783 = vmatpush.bf16.msra.mxu3 %v763_v3 }
  0x6b   : > { %383 = vmatpush.bf16.msra.mxu0 %v762_v4  ;;  %784 = vmatpush.bf16.msra.mxu1 %v762_v4 }
  0x6c   : > { %785 = vmatpush.bf16.msra.mxu2 %v762_v4  ;;  %786 = vmatpush.bf16.msra.mxu3 %v762_v4 }
  0x6f   : > { %384 = vmatpush.bf16.msra.mxu0 %v761_v5  ;;  %787 = vmatpush.bf16.msra.mxu1 %v761_v5 }
  0x70   : > { %788 = vmatpush.bf16.msra.mxu2 %v761_v5  ;;  %789 = vmatpush.bf16.msra.mxu3 %v761_v5 }
  0x73   : > { %385 = vmatpush.bf16.msra.mxu0 %v760_v6  ;;  %790 = vmatpush.bf16.msra.mxu1 %v760_v6 }
  0x74   : > { %791 = vmatpush.bf16.msra.mxu2 %v760_v6  ;;  %792 = vmatpush.bf16.msra.mxu3 %v760_v6 }
  0x77   : > { %386 = vmatpush.bf16.msra.mxu0 %v759_v13  ;;  %793 = vmatpush.bf16.msra.mxu1 %v759_v13 }
  0x78   : > { %794 = vmatpush.bf16.msra.mxu2 %v759_v13  ;;  %795 = vmatpush.bf16.msra.mxu3 %v759_v13 }
  0x7b   : > { %387 = vmatpush.bf16.msra.mxu0 %v758_v22  ;;  %796 = vmatpush.bf16.msra.mxu1 %v758_v22 }
  0x7c   : > { %797 = vmatpush.bf16.msra.mxu2 %v758_v22  ;;  %798 = vmatpush.bf16.msra.mxu3 %v758_v22 }
  0x7e   : > { %388 = vmatmul.bf16.vlgmr.msra.gmra.mxu0 %v299_v27  ;;  %393 = vmatmul.bf16.vlgmr.msra.gmra.mxu1 %v300_v28 }
  0x7f   : > { %398 = vmatmul.bf16.vlgmr.msra.gmra.mxu2 %v301_v29  ;;  %403 = vmatmul.bf16.vlgmr.msra.gmra.mxu3 %v302_v30 }
  0xfb   : > { %v389_v33 = vpop.f32.mrf.mxu0  ;;  %v394_v34 = vpop.f32.mrf.mxu1 }
  0xfc   : > { %v409_v35 = vadd.f32 %v389_v33, %v324_v31  ;;  %v411_v36 = vadd.f32 %v394_v34, %v326_v32 }
  0xfe   : > { %417 = vst [vmem:[#allocation2 + $0x30] sm:$0xff] %v409_v35 }
  0xff   : > { %419 = vst [vmem:[#allocation2 + $0x18] sm:$0xff] %v411_v36 }
 0x102   : > { %v399_v41 = vpop.f32.mrf.mxu2  ;;  %v404_v42 = vpop.f32.mrf.mxu3 }
 0x103   : > { %v413_v43 = vadd.f32 %v399_v41, %v328_v37  ;;  %v415_v44 = vadd.f32 %v404_v42, %v330_v38  ;;  %v391_v45 = vpop.f32.mrf.mxu0  ;;  %v396_v46 = vpop.f32.mrf.mxu1 }
 0x104   : > { %v410_v47 = vadd.f32 %v391_v45, %v325_v39  ;;  %v412_v48 = vadd.f32 %v396_v46, %v327_v40 }
 0x105   : > { %421 = vst [vmem:[#allocation2 + $0x8] sm:$0xff] %v413_v43 }
 0x106   : > { %423 = vst [vmem:[#allocation2 + $0x28] sm:$0xff] %v415_v44 }
 0x107   : > { %418 = vst [vmem:[#allocation2] sm:$0xff] %v410_v47 }
 0x108   : > { %420 = vst [vmem:[#allocation2 + $0x10] sm:$0xff] %v412_v48 }
 0x10a   : > { %v401_v51 = vpop.f32.mrf.mxu2  ;;  %v406_v52 = vpop.f32.mrf.mxu3  ;;  %428 = sbr.rel (%p719_p1) target bundleno = 448 (0x1c0), region = 56 }
 0x10b   : > { %v414_v53 = vadd.f32 %v401_v51, %v329_v49  ;;  %v416_v54 = vadd.f32 %v406_v52, %v331_v50 }
 0x10d   : > { %422 = vst [vmem:[#allocation2 + $0x20] sm:$0xff] %v414_v53 }
 0x10e   : > { %424 = vst [vmem:[#allocation2 + $0x38] sm:$0xff] %v416_v54 }
 0x10f   : > { %v773_v55 = vld [vmem:[#allocation8 + $0x38] sm:$0xff]  ;;  %v772_v56 = vld [vmem:[#allocation8 + $0x30] sm:$0xff]  ;;  %v771_v57 = vld [vmem:[#allocation8 + $0x28] sm:$0xff] }
 0x110   : > { %509 = vmatpush.bf16.msra.mxu0 %v773_v55  ;;  %799 = vmatpush.bf16.msra.mxu1 %v773_v55  ;;  %v770_v58 = vld [vmem:[#allocation8 + $0x20] sm:$0xff]  ;;  %v769_v59 = vld [vmem:[#allocation8 + $0x18] sm:$0xff]  ;;  %v768_v60 = vld [vmem:[#allocation8 + $0x10] sm:$0xff] }
 0x111   : > { %800 = vmatpush.bf16.msra.mxu2 %v773_v55  ;;  %801 = vmatpush.bf16.msra.mxu3 %v773_v55  ;;  %v767_v61 = vld [vmem:[#allocation8 + $0x8] sm:$0xff]  ;;  %v766_v62 = vld [vmem:[#allocation8] sm:$0xff]  ;;  %v429_v63 = vld [vmem:[#allocation2 + $0x30] sm:$0xff] }
 0x112   : > { %v430_v0 = vld [vmem:[#allocation2] sm:$0xff]  ;;  %v431_v1 = vld [vmem:[#allocation2 + $0x18] sm:$0xff]  ;;  %v432_v2 = vld [vmem:[#allocation2 + $0x10] sm:$0xff] }
 0x113   : > { %v433_v3 = vld [vmem:[#allocation2 + $0x8] sm:$0xff]  ;;  %v437_v7 = vpack.c.bf16 %v430_v0, %v429_v63  ;;  %v438_v8 = vpack.c.bf16 %v432_v2, %v431_v1  ;;  %v954_v11 = vld [vmem:[%s1472_s7] ss:$0 sm:$0xff] }
 0x114   : > { %510 = vmatpush.bf16.msra.mxu0 %v772_v56  ;;  %802 = vmatpush.bf16.msra.mxu1 %v772_v56  ;;  %v434_v4 = vld [vmem:[#allocation2 + $0x20] sm:$0xff]  ;;  %v435_v5 = vld [vmem:[#allocation2 + $0x28] sm:$0xff] }
 0x115   : > { %803 = vmatpush.bf16.msra.mxu2 %v772_v56  ;;  %804 = vmatpush.bf16.msra.mxu3 %v772_v56  ;;  %v436_v6 = vld [vmem:[#allocation2 + $0x38] sm:$0xff]  ;;  %v439_v9 = vpack.c.bf16 %v434_v4, %v433_v3 }
 0x116   : > { %v440_v10 = vpack.c.bf16 %v436_v6, %v435_v5 }
 0x118   : > { %511 = vmatpush.bf16.msra.mxu0 %v771_v57  ;;  %805 = vmatpush.bf16.msra.mxu1 %v771_v57 }
 0x119   : > { %806 = vmatpush.bf16.msra.mxu2 %v771_v57  ;;  %807 = vmatpush.bf16.msra.mxu3 %v771_v57 }
 0x11c   : > { %512 = vmatpush.bf16.msra.mxu0 %v770_v58  ;;  %808 = vmatpush.bf16.msra.mxu1 %v770_v58 }
 0x11d   : > { %809 = vmatpush.bf16.msra.mxu2 %v770_v58  ;;  %810 = vmatpush.bf16.msra.mxu3 %v770_v58 }
 0x120   : > { %513 = vmatpush.bf16.msra.mxu0 %v769_v59  ;;  %811 = vmatpush.bf16.msra.mxu1 %v769_v59 }
 0x121   : > { %812 = vmatpush.bf16.msra.mxu2 %v769_v59  ;;  %813 = vmatpush.bf16.msra.mxu3 %v769_v59 }
 0x124   : > { %514 = vmatpush.bf16.msra.mxu0 %v768_v60  ;;  %814 = vmatpush.bf16.msra.mxu1 %v768_v60 }
 0x125   : > { %815 = vmatpush.bf16.msra.mxu2 %v768_v60  ;;  %816 = vmatpush.bf16.msra.mxu3 %v768_v60 }
 0x128   : > { %515 = vmatpush.bf16.msra.mxu0 %v767_v61  ;;  %817 = vmatpush.bf16.msra.mxu1 %v767_v61 }
 0x129   : > { %818 = vmatpush.bf16.msra.mxu2 %v767_v61  ;;  %819 = vmatpush.bf16.msra.mxu3 %v767_v61 }
 0x12c   : > { %516 = vmatpush.bf16.msra.mxu0 %v766_v62  ;;  %820 = vmatpush.bf16.msra.mxu1 %v766_v62 }
 0x12d   : > { %821 = vmatpush.bf16.msra.mxu2 %v766_v62  ;;  %822 = vmatpush.bf16.msra.mxu3 %v766_v62 }
 0x12f   : > { %517 = vmatmul.bf16.vlgmr.msra.gmra.mxu0 %v437_v7  ;;  %522 = vmatmul.bf16.vlgmr.msra.gmra.mxu1 %v438_v8 }
 0x130   : > { %527 = vmatmul.bf16.vlgmr.msra.gmra.mxu2 %v439_v9  ;;  %532 = vmatmul.bf16.vlgmr.msra.gmra.mxu3 %v440_v10 }
 0x1ac   : > { %v518_v12 = vpop.f32.mrf.mxu0  ;;  %v523_v13 = vpop.f32.mrf.mxu1 }
 0x1ad   : > { %v519_v14 = vadd.f32 %v954_v11, %v518_v12  ;;  %v524_v15 = vadd.f32 %v954_v11, %v523_v13 }
 0x1af   : > { %538 = vst [vmem:[%s1356_s30] sm:$0xff] %v519_v14 }
 0x1b0   : > { %540 = vst [vmem:[%s1356_s30 + $0x10] sm:$0xff] %v524_v15 }
 0x1b3   : > { %v528_v16 = vpop.f32.mrf.mxu2  ;;  %v533_v17 = vpop.f32.mrf.mxu3 }
 0x1b4   : > { %v529_v18 = vadd.f32 %v954_v11, %v528_v16  ;;  %v534_v19 = vadd.f32 %v954_v11, %v533_v17  ;;  %v520_v20 = vpop.f32.mrf.mxu0  ;;  %v525_v21 = vpop.f32.mrf.mxu1 }
 0x1b5   : > { %v521_v22 = vadd.f32 %v954_v11, %v520_v20  ;;  %v526_v23 = vadd.f32 %v954_v11, %v525_v21 }
 0x1b6   : > { %542 = vst [vmem:[%s1356_s30 + $0x20] sm:$0xff] %v529_v18 }
 0x1b7   : > { %544 = vst [vmem:[%s1356_s30 + $0x30] sm:$0xff] %v534_v19 }
 0x1b8   : > { %539 = vst [vmem:[%s1356_s30 + $0x8] sm:$0xff] %v521_v22 }
 0x1b9   : > { %541 = vst [vmem:[%s1356_s30 + $0x18] sm:$0xff] %v526_v23 }
 0x1bb   : > { %v530_v24 = vpop.f32.mrf.mxu2  ;;  %v535_v25 = vpop.f32.mrf.mxu3 }
 0x1bc   : > { %v531_v26 = vadd.f32 %v954_v11, %v530_v24  ;;  %v536_v27 = vadd.f32 %v954_v11, %v535_v25 }
 0x1be   : > { %543 = vst [vmem:[%s1356_s30 + $0x28] sm:$0xff] %v531_v26 }
 0x1bf   : > { %545 = vst [vmem:[%s1356_s30 + $0x38] sm:$0xff] %v536_v27 }
 0x1c0 PF: > { %s1473_s9 = sld [smem:[#allocation15_spill]]  ;;  %s559_s3 = sshll.u32 %s1356_s30, 4  ;;  %s560_s3 = int_to_ptr.vmem [resolvable:$true] %s559_s3 }
 0x1c1   : > { %s1475_s8 = sld [smem:[#allocation22_spill]]  ;;  %s547_s5 = scalar_lea.sflag [#allocation5], %s264_s4 }
 0x1c6   : > { %s774_s11 = sshll.u32 %s1473_s9, 6 }
 0x1c7   : > { %s558_s22 = scalar_lea.hbm %s1475_s8, %s774_s11  ;;  %s1065_s13 = scalar_lea.hbm %s1475_s8, 256 }
 0x1c8   : > { %s561_s21 = sshll.u32 %s558_s22, 4  ;;  %s562_s21 = int_to_ptr.hbm [resolvable:$true] %s561_s21 }
 0x1c9   : > { %s1059_s28 = sshra.s32 %s562_s21, 4  ;;  %s1060_s28 = int_to_ptr.hbm [resolvable:$true] %s1059_s28 }
 0x1ca   : > { %s1061_s29 = scalar_lea.hbm %s1060_s28, 64  ;;  %p1066_p3 = scmp.lt.s32.totalorder %s1060_s28, %s1475_s8 }
 0x1cb   : > { %p1062_p4 = scmp.ne.s32.totalorder %s1060_s28, %s1061_s29  ;;  %p1067_p5 = scmp.lt.s32.totalorder %s1065_s13, %s1061_s29 }
 0x1cd   : > { %p1063_p0 = pnand %p1062_p4, %p1278_p6  ;;  %p1068_p7 = por %p1067_p5, %p1066_p3 }
 0x1cf   : > { %p1064_p2 = pneg %p1063_p0 }
 0x1d1   : > { %p1069_p8 = pnand %p1068_p7, %p1064_p2 }
 0x1d3   : > { %1072 = shalt.err (!%p1069_p8)
}
 0x1d4   : > { %s1181_s4 = smov 128   ;;  %s1182_s30 = smov 8  }
 0x1d5   : > { %833 = dma.vmem_to_hbm [thread:$0]  (%p1278_p6), %s560_s3, 1024, %s562_s21, %s547_s5, %s1181_s4, %s1181_s4, %s1182_s30  }
 0x1d6 PF: > { %s1476_s7 = sld [smem:[#allocation13_spill]]  ;;  %p855_p9 = scmp.ge.s32.totalorder %s1171_s25, 2 }
 0x1d8   : > { %p847_p12 = pnand %p855_p9, %p1284_p10 }
 0x1da   : > { %p848_p13 = pneg %p847_p12 }
 0x1dc   : > { %s576_s11 = sand.u32 1, %s1476_s7  }
 0x1dd   : > { %s577_s27 = scalar_lea.sflag [#allocation5], %s576_s11 }
 0x1de   : > { %1126 = dma.done.wait (%p848_p13), %s577_s27, 1024  }
 0x1df   : > { %1128 = vsyncadd (%p848_p13), %s577_s27, 4294966272  ;;  %s21_s25 = sadd.s32 1, %s1171_s25   ;;  %s1478_s26 = sld [smem:[#allocation18_spill]] }
 0x1e0   : > { %p18_p11 = scmp.ge.s32.totalorder %s21_s25, 10   ;;  %s1479_s15 = smov %s1135_s16 }
 0x1e1   : > { %s1480_s16 = smov %s1139_s17  ;;  %s1481_s17 = smov %s1326_s1 }
 0x1e2   : > { %s1482_s18 = smov %s1147_s19  ;;  %s1483_s19 = smov %s1151_s20 }
 0x1e3   : > { %s1484_s20 = smov %s1329_s2  ;;  %s1485_s21 = smov %s1163_s23 }
 0x1e4   : > { %s1486_s22 = smov %s1167_s24  ;;  %s1488_s24 = smov %s1494_s10 }
 0x1e5   : > { %s1487_s23 = smov %s1478_s26  ;;  %20 = sbr.rel (!%p18_p11) target bundleno = 15 (0xf), region = 98 }
 0x1ea   :  { %583 = vsyncpa [#allocation4], 1 }
 0x1eb   :  { %585 = vsyncpa [#allocation4 + $0x1], 1 }
 0x1ec   :  { %586 = vsyncpa [#allocation7], 1 }
 0x1ed   :  { %587 = vsyncpa [#allocation5], 1 }
 0x1ee   :  { %589 = vsyncpa [#allocation5 + $0x1], 1 }

</bundles_post_ra>
